<compile_context>
chip_gen: v7x
topology: tpu7x:2x2x1
jax: 0.10.0
libtpu: 0.0.40
codegen_flags: <defaults>
</compile_context>

<pallas_src>
import jax
import jax.numpy as jnp
from jax.experimental import pallas as pl
from jax.experimental.pallas import tpu as pltpu


_E_CHUNK = 512  # lanes per scores-accumulation chunk (bounds live vreg ranges)


def _attn_pool_kernel(x_ref, w_ref, o_ref):
    # x_ref: (TB, S, E) VMEM block    w_ref: (1, E) VMEM (resident)
    # o_ref: (TB, E) VMEM block
    tb, s, e = x_ref.shape
    w_row = w_ref[...].astype(jnp.float32)                      # (1, E), tiny

    # scores[b, s] = sum_e x[b, s, e] * w[e]  -> lane-dense (TB, S), f32.
    # (The Linear bias is dropped: softmax over S is shift-invariant, so a
    #  scalar added to every score cannot change the weights.)
    if e <= _E_CHUNK:
        scores = jnp.sum(x_ref[...] * w_row, axis=-1)           # (TB, S) f32
    else:
        # Chunked accumulation over 128-lane-aligned E slices keeps the live
        # (TB, S, chunk) f32 product well inside the vreg file for large E.
        scores = jnp.zeros((tb, s), jnp.float32)
        for c0 in range(0, e, _E_CHUNK):
            c1 = min(e, c0 + _E_CHUNK)
            scores = scores + jnp.sum(
                x_ref[:, :, c0:c1] * w_row[:, c0:c1], axis=-1)

    # Max-stabilised softmax over the sequence (lane) axis. Exact division:
    # the denominator is only (TB, 1) values, so this costs nothing measurable
    # in a memory-bound kernel and keeps ~1e-6-level accuracy.
    m = jnp.max(scores, axis=-1, keepdims=True)                 # (TB, 1)
    p = jnp.exp(scores - m)                                     # (TB, S)
    weights = p / jnp.sum(p, axis=-1, keepdims=True)            # (TB, S), f32

    # pooled[b, e] = sum_s weights[b, s] * x[b, s, e]  on the MXU:
    # batched contraction 'b1s,bse->b1e' with f32 accumulation, then squeeze.
    lhs = weights.astype(x_ref.dtype)[:, None, :]               # (TB, 1, S)
    pooled = jax.lax.dot_general(
        lhs, x_ref[...],
        dimension_numbers=(((2,), (1,)), ((0,), (0,))),
        preferred_element_type=jnp.float32)                     # (TB, 1, E) f32
    o_ref[...] = pooled[:, 0, :].astype(o_ref.dtype)


def _device_vmem_bytes():
    """Physical VMEM per TensorCore (64 MiB on v7x, 128 MiB on v5e/v6e)."""
    try:
        return int(pltpu.get_tpu_info().vmem_capacity_bytes)
    except Exception:
        return 128 << 20  # conservative v5e/v6e assumption


def _choose_tb(B, S, E, itemsize, *, max_tile_bytes, min_steps):
    """Pick the batch-tile size TB.

    Preferences: sublane-aligned divisors of B (dense, unmasked stores) within
    the per-buffer VMEM budget, keeping >= min_steps grid steps when possible;
    tiny batches fall back to TB == B (full-dim block -> layout-legal).
    """
    row_bytes = max(1, S * E * itemsize)
    cap = min(B, max(1, max_tile_bytes // row_bytes))
    sublane = {4: 8, 2: 16, 1: 32}.get(itemsize, 8)   # dtype-aware packing

    divisors = [d for d in range(1, B + 1) if B % d == 0]
    aligned = [d for d in divisors if d % sublane == 0 and d <= cap]
    if aligned:
        deep = [d for d in aligned if B // d >= min_steps]
        # Largest aligned divisor that still leaves enough steps to hide the
        # prologue DMA; otherwise the smallest aligned one (maximises steps).
        return deep[-1] if deep else aligned[0]

    # No sublane-aligned divisor fits the budget (tiny or odd B). A full-dim
    # block is always layout-legal and stores densely — take the whole batch
    # unless it is wildly over budget; then the largest divisor under budget.
    if B * row_bytes <= 4 * max_tile_bytes or B < sublane:
        return B
    under = [d for d in divisors if d <= cap]
    return under[-1] if under else 1


def attention_pooling(x, w, b=None, *, tb=None, vmem_limit_bytes=None):
    """x: (B, S, E); w: (E, 1); b: (1,) or None. Returns pooled (B, E).

    The bias `b` is accepted for API parity with nn.Linear(emb_dim, 1) but is
    not used: softmax over the sequence axis is shift-invariant, so adding a
    scalar to every score leaves the weights (and the pooled output) unchanged.
    """
    B, S, E = x.shape
    w_row = w.reshape(1, E)  # lane-dense row for the VPU/XLU projection
    itemsize = x.dtype.itemsize

    vmem_total = _device_vmem_bytes()
    # Per-(double-)buffer slab budget: generous on 128 MiB parts (v5e/v6e),
    # tighter on 64 MiB parts (v7x). Min-steps target: deeper on 2-TC v7x.
    if vmem_total <= (64 << 20):          # v7x-class
        max_tile_bytes = 4 << 20
        min_steps = 8
    else:                                 # v5e / v6e (128 MiB VMEM)
        max_tile_bytes = 8 << 20
        min_steps = 4

    if tb is None:
        tb = _choose_tb(B, S, E, itemsize,
                        max_tile_bytes=max_tile_bytes, min_steps=min_steps)
    assert B % tb == 0, f"tb={tb} must divide B={B}"
    grid = (B // tb,)

    # Raise the scoped VMEM limit only when the double-buffered tiles need it,
    # and never beyond ~75% of physical VMEM (v7x has only 64 MiB per core).
    if vmem_limit_bytes is None:
        need = 2 * (tb * S * E + tb * E) * itemsize + (2 << 20)
        if need > (10 << 20):             # below v5e's 16 MiB default limit
            vmem_limit_bytes = min(2 * need, int(0.75 * vmem_total))

    params = dict(dimension_semantics=("parallel",))
    if vmem_limit_bytes is not None:
        params["vmem_limit_bytes"] = int(vmem_limit_bytes)

    return pl.pallas_call(
        _attn_pool_kernel,
        out_shape=jax.ShapeDtypeStruct((B, E), x.dtype),
        grid_spec=pltpu.PrefetchScalarGridSpec(
            num_scalar_prefetch=0,
            grid=grid,
            in_specs=[
                pl.BlockSpec((tb, S, E), lambda i: (i, 0, 0)),   # batch slab
                pl.BlockSpec((1, E), lambda i: (0, 0)),          # weight row (resident)
            ],
            out_specs=pl.BlockSpec((tb, E), lambda i: (i, 0)),   # dense store
        ),
        compiler_params=pltpu.CompilerParams(**params),
    )(x, w_row)


def attention_pooling_ref(x, w, b):
    scores = jnp.einsum("bse,eo->bso", x, w,
                        precision=jax.lax.Precision.HIGHEST) + b  # (B, S, 1)
    weights = jax.nn.softmax(scores, axis=1)
    return jnp.sum(x * weights, axis=1)                           # (B, E)


if __name__ == "__main__":
    def run_case(B, S, E, seed):
        key = jax.random.PRNGKey(seed)
        kx, kw, kb = jax.random.split(key, 3)
        x = jax.random.normal(kx, (B, S, E), dtype=jnp.float32)
        # Deterministic "Linear(emb_dim, 1)" parameters (uniform, PyTorch-style).
        bound = 1.0 / (E ** 0.5)
        w = jax.random.uniform(kw, (E, 1), minval=-bound, maxval=bound,
                               dtype=jnp.float32)
        b = jax.random.uniform(kb, (1,), minval=-bound, maxval=bound,
                               dtype=jnp.float32)

        out = jax.block_until_ready(attention_pooling(x, w, b))
        ref = attention_pooling_ref(x, w, b)
        assert out.shape == (B, E)
        # Exact softmax division restores tight numerics; small margin left for
        # f32 matmul rounding on the MXU (observed error ~1e-6).
        assert jnp.allclose(out, ref, atol=1e-4, rtol=1e-4), (
            f"mismatch vs reference for shape {(B, S, E)}")

    # Small shape from the module spec (B=2, seq=8, emb=32):
    # tb == B (full-dim block, dense store), grid=(1,).
    run_case(2, 8, 32, seed=0)
    # Larger shape exercising the sublane-aligned batched path:
    # tb=8, grid=(2,), (8, 128, 128) slabs and dense (8, 128) stores.
    run_case(16, 128, 128, seed=1)

    print("KERNEL_OK")
</pallas_src>

<mosaic_0001>
module attributes {stable_mosaic.version = 11 : i64} {
  func.func @_attn_pool_kernel(%arg0: i32, %arg1: memref<2x8x32xf32, #tpu.memory_space<vmem>>, %arg2: memref<1x32xf32, #tpu.memory_space<vmem>>, %arg3: memref<2x32xf32, #tpu.memory_space<vmem>>) attributes {dimension_semantics = [#tpu.dimension_semantics<parallel>], iteration_bounds = array<i64: 1>, scalar_prefetch = 0 : i64, scratch_operands = 0 : i64, tpu.core_type = #tpu.core_type<tc>, window_params = [{transform_indices = @transform_0, window_bounds = array<i64: 2, 8, 32>}, {pipeline_mode = #tpu.pipeline_mode<synchronous>, transform_indices = @transform_1, window_bounds = array<i64: 1, 32>}, {transform_indices = @transform_2, window_bounds = array<i64: 2, 32>}]} {
    %c0 = arith.constant 0 : index
    %c0_0 = arith.constant 0 : index
    %0 = vector.load %arg2[%c0, %c0_0] : memref<1x32xf32, #tpu.memory_space<vmem>>, vector<1x32xf32>
    %c0_1 = arith.constant 0 : index
    %c0_2 = arith.constant 0 : index
    %c0_3 = arith.constant 0 : index
    %1 = vector.load %arg1[%c0_1, %c0_2, %c0_3] : memref<2x8x32xf32, #tpu.memory_space<vmem>>, vector<2x8x32xf32>
    %2 = vector.shape_cast %0 : vector<1x32xf32> to vector<1x1x32xf32>
    %3 = vector.broadcast %2 : vector<1x1x32xf32> to vector<2x8x32xf32>
    %4 = arith.mulf %1, %3 : vector<2x8x32xf32>
    %cst = arith.constant dense<0.000000e+00> : vector<2x8xf32>
    %5 = vector.multi_reduction <add>, %4, %cst [2] : vector<2x8x32xf32> to vector<2x8xf32>
    %cst_4 = arith.constant dense<0xFF800000> : vector<2xf32>
    %6 = vector.multi_reduction <maximumf>, %5, %cst_4 [1] : vector<2x8xf32> to vector<2xf32>
    %7 = vector.shape_cast %6 : vector<2xf32> to vector<2x1xf32>
    %8 = vector.broadcast %7 : vector<2x1xf32> to vector<2x8xf32>
    %9 = arith.subf %5, %8 : vector<2x8xf32>
    %10 = math.exp %9 : vector<2x8xf32>
    %cst_5 = arith.constant dense<0.000000e+00> : vector<2xf32>
    %11 = vector.multi_reduction <add>, %10, %cst_5 [1] : vector<2x8xf32> to vector<2xf32>
    %12 = vector.shape_cast %11 : vector<2xf32> to vector<2x1xf32>
    %13 = vector.broadcast %12 : vector<2x1xf32> to vector<2x8xf32>
    %14 = arith.divf %10, %13 : vector<2x8xf32>
    %15 = vector.shape_cast %14 : vector<2x8xf32> to vector<2x1x8xf32>
    %c0_6 = arith.constant 0 : index
    %c0_7 = arith.constant 0 : index
    %c0_8 = arith.constant 0 : index
    %16 = vector.load %arg1[%c0_6, %c0_7, %c0_8] : memref<2x8x32xf32, #tpu.memory_space<vmem>>, vector<2x8x32xf32>
    %cst_9 = arith.constant dense<0.000000e+00> : vector<2x1x32xf32>
    %17 = tpu.matmul %15, %16, %cst_9 {dimension_numbers = #tpu.dot_dimension_numbers<[2], [1], [1], [2], [0, 0, 0, 1, 1, 2], [0], [0]>} : vector<2x1x8xf32>, vector<2x8x32xf32>, vector<2x1x32xf32> -> vector<2x1x32xf32>
    %18 = vector.shape_cast %17 : vector<2x1x32xf32> to vector<2x32xf32>
    %c0_10 = arith.constant 0 : index
    %c0_11 = arith.constant 0 : index
    %19 = vector.load %arg3[%c0_10, %c0_11] : memref<2x32xf32, #tpu.memory_space<vmem>>, vector<2x32xf32>
    tpu.vector_store %arg3[%c0_10, %c0_11], %18 {strides = array<i32>} : memref<2x32xf32, #tpu.memory_space<vmem>>, vector<2x32xf32>,
    return
  }
  func.func @transform_0(%arg0: i32) -> (i32, i32, i32) {
    %c0_i32 = arith.constant 0 : i32
    %c0_i32_0 = arith.constant 0 : i32
    %c0_i32_1 = arith.constant 0 : i32
    return %arg0, %c0_i32, %c0_i32_0 : i32, i32, i32
  }
  func.func @transform_1(%arg0: i32) -> (i32, i32) {
    %c0_i32 = arith.constant 0 : i32
    %c0_i32_0 = arith.constant 0 : i32
    %c0_i32_1 = arith.constant 0 : i32
    return %c0_i32, %c0_i32_0 : i32, i32
  }
  func.func @transform_2(%arg0: i32) -> (i32, i32) {
    %c0_i32 = arith.constant 0 : i32
    %c0_i32_0 = arith.constant 0 : i32
    return %arg0, %c0_i32 : i32, i32
  }
}

</mosaic_0001>

<bundles_post_ra>
// kernel: tpu_custom_call.1
= control target key start
LH: loop header
LB: loop body
LE: loop exit
PB: predicated region body
PF: predicated region fallthrough
CT: control target
= control target key end

     0   :  { %7 = vsyncpa [#allocation3], 0  ;;  %s439_s0 = inlined_call_operand.hbm [shape: f32[2,8,32], index: 0, kind: input, shape index: {}]   ;;  %s440_s1 = inlined_call_operand.vmem [shape: f32[1,32], index: 1, kind: input, shape index: {}]   ;;  %s441_s2 = inlined_call_operand.hbm [shape: f32[2,32], index: 2, kind: output, shape index: {}]  }
   0x1   :  { %8 = vsyncpa [#allocation4], 0  ;;  %s381_s9 = smov [#allocation2]   ;;  %s333_s13 = scalar_lea.hbm %s439_s0, 256 }
   0x2   :  { %s14_s10 = sshll.u32 %s381_s9, 4  ;;  %p334_p0 = scmp.ne.s32.totalorder %s439_s0, %s333_s13  ;;  %s15_s10 = int_to_ptr.vmem [resolvable:$true] %s14_s10 }
   0x3   :  { %p337_p1 = scmp.lt.u32.totalorder %s333_s13, %s439_s0 }
   0x5   :  { %p339_p2 = pnand %p337_p1, %p334_p0 }
   0x7   :  { %342 = shalt.err (!%p339_p2)
}
   0x8   :  { %s343_s18 = scalar_lea.vmem %s15_s10, 256  ;;  %p348_p4 = scmp.lt.s32.totalorder %s15_s10, %s15_s10 }
   0x9   :  { %p344_p3 = scmp.ne.s32.totalorder %s15_s10, %s343_s18  ;;  %p349_p5 = scmp.lt.s32.totalorder %s343_s18, %s343_s18 }
   0xb   :  { %p350_p6 = por %p349_p5, %p348_p4 }
   0xd   :  { %p351_p7 = pnand %p350_p6, %p344_p3 }
   0xf   :  { %354 = shalt.err (!%p351_p7)
}
  0x10   :  { %s382_s19 = smov 128   ;;  %s383_s20 = smov 8  }
  0x11   :  { %20 = dma.hbm_to_vmem [thread:$0]  %s439_s0, 256, %s15_s10, [#allocation3], %s382_s19, %s382_s19, %s383_s20  }
  0x12   :  { %377 = dma.done.wait [#allocation3], 256  }
  0x13   :  { %378 = vsyncadd [#allocation3], 4294967040  ;;  %v299_v0 = vld [vmem:[%s440_s1] ss:$0 sm:$0xff]  ;;  %vm37_vm0 = vcmask 261120   ;;  %v28_v2 = vld [vmem:[#allocation2 + $0x8] sm:$0xff]  ;;  %v46_v7 = vlaneseq }
  0x14   :  { %v418_v1 = vld [vmem:[#allocation2] sm:$0xff]  ;;  %v36_v4 = vmul.f32 %v299_v0, %v28_v2  ;;  %vm56_vm1 = vcmask 1041409   ;;  %vm59_vm2 = vcmask 58368   ;;  %v384_v17 = vmov 0   ;;  %s387_s0 = smov [#allocation5]  }
  0x15   :  { %v35_v3 = vmul.f32 %v299_v0, %v418_v1  ;;  %v47_v8 = vand.u32 127, %v46_v7  ;;  %v49_v9 = vshrl.u32 %v46_v7, 7  ;;  %324 = vset.pattern.permute.xlu0 %v384_v17  ;;  %323 = vset.pattern.permute.xlu1 %v384_v17  ;;  %v385_v41 = vmov 0.0   ;;  %s290_s1 = sshll.u32 %s387_s0, 4  ;;  %s291_s1 = int_to_ptr.vmem [resolvable:$true] %s290_s1 }
  0x16   :  { %v41_v6 = vsel %vm37_vm0, %v36_v4, 0.0  ;;  %311 = vmatprep.subr.mxu1 %v385_v41  ;;  %vm386_vm3 = vmmov 0   ;;  %306 = vmatprep.subr.mxu0 %v385_v41  ;;  %vm124_vm4 = vcmask 64512   ;;  %vm282_vm5 = vcmask 254976   ;;  %s355_s25 = scalar_lea.vmem %s291_s1, 32  ;;  %p360_p9 = scmp.lt.s32.totalorder %s291_s1, %s291_s1 }
  0x17   :  { %v38_v5 = vsel %vm37_vm0, %v35_v3, 0.0  ;;  %v50_v11 = vsub.s32 %v47_v8, %v49_v9  ;;  %v66_v18 = vsub.s32 0, %v49_v9  ;;  %v70_v19 = vsub.s32 1, %v49_v9  ;;  %312 = vmatpush3.msra.mxu1 %v28_v2  ;;  %313 = vmatprep.mubr.msk.f32.mxu1 %vm386_vm3, %v385_v41  ;;  %p356_p8 = scmp.ne.s32.totalorder %s291_s1, %s355_s25  ;;  %p361_p10 = scmp.lt.s32.totalorder %s355_s25, %s355_s25 }
  0x18   :  { %39 = vadd.xlane.f32.xlu0 %v38_v5  ;;  %308 = vmatprep.mubr.msk.f32.mxu0 %vm386_vm3, %v385_v41 }
  0x19   :  { %307 = vmatpush3.msra.mxu0 %v418_v1  ;;  %p362_p11 = por %p361_p10, %p360_p9 }
  0x1b   :  { %p363_p12 = pnand %p362_p11, %p356_p8 }
  0x1c   :  { %42 = vadd.xlane.f32.xlu0 %v41_v6 }
  0xa5   :  { %v40_v10 = vpop.xlane.xlu0 %39 }
  0xa6   :  { %v51_v13 = vrot.slane %v40_v10, %v50_v11 }
  0xa9   :  { %v43_v12 = vpop.xlane.xlu0 %42 }
  0xaa   :  { %v55_v14 = vrot.slane %v43_v12, %v50_v11 }
  0xac   :  { %v57_v15 = vsel %vm56_vm1, %v55_v14, %v51_v13 }
  0xad   :  { %v60_v16 = vsel %vm59_vm2, %v57_v15, -inf }
  0xae   :  { %61 = vmax.xlane.f32.xlu1 %v60_v16 }
 0x13b   :  { %v62_v20 = vpop.xlane.xlu1 %61 }
 0x13c   :  { %v67_v21 = vrot.slane %v62_v20, %v66_v18  ;;  %v71_v22 = vrot.slane %v62_v20, %v70_v19 }
 0x13e   :  { %v74_v23 = vsub.f32 %v40_v10, %v67_v21  ;;  %v75_v24 = vsub.f32 %v43_v12, %v71_v22 }
 0x140   :  { %v76_v25 = vmul.f32 1.442695, %v74_v23  ;;  %v78_v26 = vmul.f32 1.442695, %v75_v24 }
 0x142   :  { %325 = vpow2.f32 %v76_v25 }
 0x143   :  { %327 = vpow2.f32 %v78_v26 }
 0x14c   :  { %v326_v27 = vpop.eup %325 }
 0x14d   :  { %v328_v28 = vpop.eup %327  ;;  %83 = vperm.xlu1 %323, %v326_v27  }
 0x14e   :  { %86 = vperm.xlu0 %324, %v328_v28  }
 0x1cc   :  { %v84_v29 = vpop.permute.xlu1 %83 }
 0x1cd   :  { %v87_v30 = vpop.permute.xlu0 %86  ;;  %v91_v31 = vrot.slane %v84_v29, %v50_v11 }
 0x1ce   :  { %v95_v32 = vrot.slane %v87_v30, %v50_v11 }
 0x1d0   :  { %v96_v33 = vsel %vm56_vm1, %v95_v32, %v91_v31 }
 0x1d1   :  { %v98_v34 = vsel %vm59_vm2, %v96_v33, 0.0 }
 0x1d2   :  { %99 = vadd.xlane.f32.xlu1 %v98_v34 }
 0x25f   :  { %v100_v35 = vpop.xlane.xlu1 %99 }
 0x260   :  { %v109_v36 = vrot.slane %v100_v35, %v70_v19  ;;  %v105_v37 = vrot.slane %v100_v35, %v66_v18 }
 0x262   :  { %329 = vrcp.f32 %v109_v36 }
 0x263   :  { %331 = vrcp.f32 %v105_v37 }
 0x26c   :  { %v330_v38 = vpop.eup %329 }
 0x26d   :  { %v115_v39 = vmul.f32 %v330_v38, %v328_v28  ;;  %v332_v40 = vpop.eup %331 }
 0x26e   :  { %v113_v42 = vmul.f32 %v332_v40, %v326_v27 }
 0x26f   :  { %199 = vperm.xlu0 %324, %v115_v39  }
 0x273   :  { %118 = vperm.xlu0 %324, %v113_v42  }
 0x2ee   :  { %v200_v43 = vpop.permute.xlu0 %199 }
 0x2ef   :  { %v204_v44 = vrot.slane %v200_v43, %v50_v11 }
 0x2f1   :  { %314 = vmatmul.mubr.msk.f32.vlgmr.msra.gmra.mrb[0].mxu1 %vm124_vm4, %v204_v44 }
 0x2f2   :  { %v119_v45 = vpop.permute.xlu0 %118 }
 0x2f3   :  { %v123_v46 = vrot.slane %v119_v45, %v50_v11 }
 0x2f5   :  { %309 = vmatmul.mubr.msk.f32.vlgmr.msra.gmra.mrb[0].mxu0 %vm124_vm4, %v123_v46 }
 0x3c4   :  { %v273_v47 = vpop.f32.mrb[0].mxu1 }
 0x3c5   :  { %v315_v48 = vpop.f32.mrb[1].mxu1  ;;  %v279_v49 = vrot.slane %v273_v47, 7 }
 0x3c8   :  { %v193_v50 = vpop.f32.mrb[0].mxu0 }
 0x3c9   :  { %v280_v51 = vsel %vm56_vm1, %v279_v49, %v193_v50  ;;  %v310_v52 = vpop.f32.mrb[1].mxu0 }
 0x3ca   :  { %283 = vst.msk [vmem:[#allocation5] sm:$0x3] %vm282_vm5, %v280_v51 }
 0x3cb   :  { %366 = shalt.err (!%p363_p12)
}
 0x3cc   :  { %s367_s28 = scalar_lea.hbm %s441_s2, 32 }
 0x3cd   :  { %p368_p13 = scmp.ne.s32.totalorder %s441_s2, %s367_s28  ;;  %p371_p0 = scmp.lt.u32.totalorder %s367_s28, %s441_s2 }
 0x3cf   :  { %p373_p1 = pnand %p371_p0, %p368_p13 }
 0x3d1   :  { %376 = shalt.err (!%p373_p1)
}
 0x3d2   :  { %293 = dma.vmem_to_hbm [thread:$0]  %s291_s1, 32, %s441_s2, [#allocation4]  }
 0x3d3   :  { %379 = dma.done.wait [#allocation4], 32  }
 0x3d4   :  { %380 = vsyncadd [#allocation4], 4294967264 }
 0x3d5   :  { %297 = vsyncpa [#allocation3], 1 }
 0x3d6   :  { %298 = vsyncpa [#allocation4], 1 }

</bundles_post_ra>
